<compile_context>
chip_gen: v7x
topology: tpu7x:2x2x1
jax: 0.10.0
libtpu: 0.0.40
codegen_flags: <defaults>
</compile_context>

<pallas_src>
import jax
import jax.numpy as jnp
from jax.experimental import pallas as pl
from jax.experimental.pallas import tpu as pltpu


# ---------------------------------------------------------------------------
# Kernel 1: hoisted input projection — one large (T*B, D) @ (D, 4H) matmul.
# ---------------------------------------------------------------------------
def input_proj_kernel(x_ref, wih_ref, b_ref, gx_ref):
    # x_ref:  (T*B, D)  bf16   (time-major rows: row index = t*B + b)
    # wih_ref:(D, 4H)   bf16   (gate columns in (i, f, o, g) order)
    # b_ref:  (1, 4H)   f32    (fused b_ih + b_hh, reordered)
    # gx_ref: (T*B, 4H) f32
    gx_ref[...] = (
        jnp.dot(x_ref[...], wih_ref[...], preferred_element_type=jnp.float32)
        + b_ref[...]
    )


# ---------------------------------------------------------------------------
# Kernel 2: LSTM recurrence over T (chunked grid) + final FC on last h.
# ---------------------------------------------------------------------------
def lstm_recurrence_kernel(gx_ref, whh_ref, wfc_ref, bfc_ref, out_ref,
                           h_scr, c_scr):
    # gx_ref:  (TCHUNK, B, 4H) f32  precomputed x@W_ih + bias, time-major
    # whh_ref: (H, 4H)         bf16 (gate columns (i, f, o, g))
    # wfc_ref: (H, O_pad)      bf16
    # bfc_ref: (1, O_pad)      f32
    # out_ref: (B, O_pad)      f32
    # h_scr/c_scr: (B, H) f32 VMEM scratch, persist across grid steps
    chunk = pl.program_id(0)
    H = h_scr.shape[-1]
    t_chunk = gx_ref.shape[0]

    @pl.when(chunk == 0)
    def _():
        h_scr[...] = jnp.zeros(h_scr.shape, h_scr.dtype)
        c_scr[...] = jnp.zeros(c_scr.shape, c_scr.dtype)

    def step(tt, carry):
        h, c = carry
        # Recurrent matmul only (input projection already folded into gx).
        gates = gx_ref[tt] + jnp.dot(
            h.astype(jnp.bfloat16), whh_ref[...],
            preferred_element_type=jnp.float32)          # (B, 4H) f32
        # Gate columns are (i, f, o, g): one fused sigmoid on (B, 3H).
        ifo = jax.nn.sigmoid(gates[:, 0:3 * H])
        i_g = ifo[:, 0 * H:1 * H]
        f_g = ifo[:, 1 * H:2 * H]
        o_g = ifo[:, 2 * H:3 * H]
        g_g = jnp.tanh(gates[:, 3 * H:4 * H])
        c_new = f_g * c + i_g * g_g
        h_new = o_g * jnp.tanh(c_new)
        return h_new, c_new

    h0 = h_scr[...]
    c0 = c_scr[...]
    h_last, c_last = jax.lax.fori_loop(0, t_chunk, step, (h0, c0), unroll=True)
    h_scr[...] = h_last
    c_scr[...] = c_last

    @pl.when(chunk == pl.num_programs(0) - 1)
    def _():
        y = jnp.dot(h_last.astype(jnp.bfloat16), wfc_ref[...],
                    preferred_element_type=jnp.float32) + bfc_ref[...]
        out_ref[...] = y.astype(out_ref.dtype)


# ---------------------------------------------------------------------------
# Wrapper
# ---------------------------------------------------------------------------
def _reorder_gates(w4h):
    """Reorder last axis from PyTorch (i, f, g, o) to kernel (i, f, o, g)."""
    i, f, g, o = jnp.split(w4h, 4, axis=-1)
    return jnp.concatenate([i, f, o, g], axis=-1)


def lstm_model_forward(x_btd, params, *, t_chunk=4):
    """x_btd: (B, T, D) float32 (batch_first, like the PyTorch module).

    params are PyTorch-layout: (w_ih (4H,D), w_hh (4H,H), b_ih (4H,),
    b_hh (4H,), w_fc (O,H), b_fc (O,)).
    """
    w_ih, w_hh, b_ih, b_hh, w_fc, b_fc = params
    B, T, D = x_btd.shape
    H = w_hh.shape[1]
    O = w_fc.shape[0]
    O_pad = ((O + 127) // 128) * 128                     # lane-dense FC output

    # ---- one-time parameter prep (tiny) ------------------------------------
    wih_t = _reorder_gates(jnp.transpose(w_ih))          # (D, 4H)
    whh_t = _reorder_gates(jnp.transpose(w_hh))          # (H, 4H)
    bias = _reorder_gates((b_ih + b_hh)[None, :])        # (1, 4H) fused bias
    wfc_pad = jnp.zeros((H, O_pad), jnp.float32).at[:, :O].set(jnp.transpose(w_fc))
    bfc_pad = jnp.zeros((1, O_pad), jnp.float32).at[:, :O].set(b_fc[None, :])

    wih_bf = wih_t.astype(jnp.bfloat16)
    whh_bf = whh_t.astype(jnp.bfloat16)
    wfc_bf = wfc_pad.astype(jnp.bfloat16)

    # ---- stage 1: hoisted input projection (one large matmul) --------------
    # Transposing x (the smallest tensor) once gives time-major gates so the
    # recurrence indexes a leading axis with a cheap ref[t] load.
    x_tbd = jnp.transpose(x_btd, (1, 0, 2))              # (T, B, D)
    x_2d = x_tbd.reshape(T * B, D).astype(jnp.bfloat16)  # free reshape
    gx = pl.pallas_call(
        input_proj_kernel,
        out_shape=jax.ShapeDtypeStruct((T * B, 4 * H), jnp.float32),
    )(x_2d, wih_bf, bias)
    gx = gx.reshape(T, B, 4 * H)                         # time-major gates

    # ---- stage 2: chunked recurrence + final FC -----------------------------
    if t_chunk is None or T % t_chunk != 0:
        t_chunk = T
    n_chunks = T // t_chunk

    out_pad = pl.pallas_call(
        lstm_recurrence_kernel,
        out_shape=jax.ShapeDtypeStruct((B, O_pad), jnp.float32),
        grid_spec=pltpu.PrefetchScalarGridSpec(
            num_scalar_prefetch=0,
            grid=(n_chunks,),
            in_specs=[
                pl.BlockSpec((t_chunk, B, 4 * H), lambda i: (i, 0, 0)),  # gx chunk
                pl.BlockSpec((H, 4 * H), lambda i: (0, 0)),              # W_hh^T
                pl.BlockSpec((H, O_pad), lambda i: (0, 0)),              # W_fc^T
                pl.BlockSpec((1, O_pad), lambda i: (0, 0)),              # b_fc
            ],
            out_specs=pl.BlockSpec((B, O_pad), lambda i: (0, 0)),
            scratch_shapes=[
                pltpu.VMEM((B, H), jnp.float32),                          # h state
                pltpu.VMEM((B, H), jnp.float32),                          # c state
            ],
        ),
        compiler_params=pltpu.CompilerParams(
            dimension_semantics=("arbitrary",)),
    )(gx, whh_bf, wfc_bf, bfc_pad)

    return out_pad[:, :O]


# ---------------------------------------------------------------------------
# Params / reference
# ---------------------------------------------------------------------------
def init_params(key, input_dim, hidden_dim, output_dim):
    """PyTorch-layout parameters (nn.LSTM + nn.Linear default-init style)."""
    k = jax.random.split(key, 6)
    s = 1.0 / jnp.sqrt(hidden_dim)
    w_ih = jax.random.uniform(k[0], (4 * hidden_dim, input_dim),
                              minval=-s, maxval=s, dtype=jnp.float32)
    w_hh = jax.random.uniform(k[1], (4 * hidden_dim, hidden_dim),
                              minval=-s, maxval=s, dtype=jnp.float32)
    b_ih = jax.random.uniform(k[2], (4 * hidden_dim,),
                              minval=-s, maxval=s, dtype=jnp.float32)
    b_hh = jax.random.uniform(k[3], (4 * hidden_dim,),
                              minval=-s, maxval=s, dtype=jnp.float32)
    w_fc = jax.random.uniform(k[4], (output_dim, hidden_dim),
                              minval=-s, maxval=s, dtype=jnp.float32)
    b_fc = jax.random.uniform(k[5], (output_dim,),
                              minval=-s, maxval=s, dtype=jnp.float32)
    return (w_ih, w_hh, b_ih, b_hh, w_fc, b_fc)


def reference_forward(x_btd, params):
    """Pure-JAX f32 reference (PyTorch gate order i, f, g, o)."""
    w_ih, w_hh, b_ih, b_hh, w_fc, b_fc = params
    B = x_btd.shape[0]
    H = w_hh.shape[1]

    def step(carry, x_t):
        h, c = carry
        gates = x_t @ w_ih.T + h @ w_hh.T + b_ih + b_hh
        i = jax.nn.sigmoid(gates[:, 0 * H:1 * H])
        f = jax.nn.sigmoid(gates[:, 1 * H:2 * H])
        g = jnp.tanh(gates[:, 2 * H:3 * H])
        o = jax.nn.sigmoid(gates[:, 3 * H:4 * H])
        c = f * c + i * g
        h = o * jnp.tanh(c)
        return (h, c), None

    h0 = jnp.zeros((B, H), jnp.float32)
    c0 = jnp.zeros((B, H), jnp.float32)
    (h_last, _), _ = jax.lax.scan(step, (h0, c0),
                                  jnp.transpose(x_btd, (1, 0, 2)))
    return h_last @ w_fc.T + b_fc


if __name__ == "__main__":
    # batch=8 fills the sublane dim, hidden=128 makes gate slices lane-aligned,
    # seq=8 / input_dim=16 / output_dim=8 stay small.
    B, T, D, H, O = 8, 8, 16, 128, 8

    key = jax.random.PRNGKey(0)
    kx, kp = jax.random.split(key)
    x = jax.random.normal(kx, (B, T, D), dtype=jnp.float32)
    params = init_params(kp, D, H, O)

    fwd = jax.jit(lambda xx: lstm_model_forward(xx, params, t_chunk=4))
    out = jax.block_until_ready(fwd(x))

    ref = reference_forward(x, params)
    assert out.shape == (B, O)
    # bf16 matmul operands (f32 accumulation) -> slightly looser tolerance.
    assert jnp.allclose(out, ref, atol=2e-2, rtol=2e-2), "mismatch vs reference"

    print("KERNEL_OK")
</pallas_src>

<mosaic_0001>
module attributes {stable_mosaic.version = 11 : i64} {
  func.func @input_proj_kernel(%arg0: memref<64x16xbf16, #tpu.memory_space<vmem>>, %arg1: memref<16x512xbf16, #tpu.memory_space<vmem>>, %arg2: memref<1x512xf32, #tpu.memory_space<vmem>>, %arg3: memref<64x512xf32, #tpu.memory_space<vmem>>) attributes {dimension_semantics = [], scalar_prefetch = 0 : i64, scratch_operands = 0 : i64, tpu.core_type = #tpu.core_type<tc>} {
    %c0 = arith.constant 0 : index
    %c0_0 = arith.constant 0 : index
    %0 = vector.load %arg0[%c0, %c0_0] : memref<64x16xbf16, #tpu.memory_space<vmem>>, vector<64x16xbf16>
    %c0_1 = arith.constant 0 : index
    %c0_2 = arith.constant 0 : index
    %1 = vector.load %arg1[%c0_1, %c0_2] : memref<16x512xbf16, #tpu.memory_space<vmem>>, vector<16x512xbf16>
    %cst = arith.constant dense<0.000000e+00> : vector<64x512xf32>
    %2 = tpu.matmul %0, %1, %cst {dimension_numbers = #tpu.dot_dimension_numbers<[1], [0], [0], [1], [0, 0, 1, 1], [], []>} : vector<64x16xbf16>, vector<16x512xbf16>, vector<64x512xf32> -> vector<64x512xf32>
    %c0_3 = arith.constant 0 : index
    %c0_4 = arith.constant 0 : index
    %3 = vector.load %arg2[%c0_3, %c0_4] : memref<1x512xf32, #tpu.memory_space<vmem>>, vector<1x512xf32>
    %4 = vector.broadcast %3 : vector<1x512xf32> to vector<64x512xf32>
    %5 = arith.addf %2, %4 : vector<64x512xf32>
    %c0_5 = arith.constant 0 : index
    %c0_6 = arith.constant 0 : index
    %6 = vector.load %arg3[%c0_5, %c0_6] : memref<64x512xf32, #tpu.memory_space<vmem>>, vector<64x512xf32>
    tpu.vector_store %arg3[%c0_5, %c0_6], %5 {strides = array<i32>} : memref<64x512xf32, #tpu.memory_space<vmem>>, vector<64x512xf32>,
    return
  }
}

module attributes {stable_mosaic.version = 11 : i64} {
  func.func @lstm_recurrence_kernel(%arg0: i32, %arg1: memref<4x8x512xf32, #tpu.memory_space<vmem>>, %arg2: memref<128x512xbf16, #tpu.memory_space<vmem>>, %arg3: memref<128x128xbf16, #tpu.memory_space<vmem>>, %arg4: memref<1x128xf32, #tpu.memory_space<vmem>>, %arg5: memref<8x128xf32, #tpu.memory_space<vmem>>, %arg6: memref<8x128xf32, #tpu.memory_space<vmem>>, %arg7: memref<8x128xf32, #tpu.memory_space<vmem>>) attributes {dimension_semantics = [#tpu.dimension_semantics<arbitrary>], iteration_bounds = array<i64: 2>, scalar_prefetch = 0 : i64, scratch_operands = 2 : i64, tpu.core_type = #tpu.core_type<tc>, window_params = [{transform_indices = @transform_0, window_bounds = array<i64: 4, 8, 512>}, {pipeline_mode = #tpu.pipeline_mode<synchronous>, transform_indices = @transform_1, window_bounds = array<i64: 128, 512>}, {pipeline_mode = #tpu.pipeline_mode<synchronous>, transform_indices = @transform_2, window_bounds = array<i64: 128, 128>}, {pipeline_mode = #tpu.pipeline_mode<synchronous>, transform_indices = @transform_3, window_bounds = array<i64: 1, 128>}, {pipeline_mode = #tpu.pipeline_mode<synchronous>, transform_indices = @transform_4, window_bounds = array<i64: 8, 128>}]} {
    %c0_i32 = arith.constant 0 : i32
    %0 = arith.cmpi eq, %arg0, %c0_i32 : i32
    %1 = arith.extui %0 : i1 to i32
    %c0_i32_0 = arith.constant 0 : i32
    %2 = arith.cmpi ne, %1, %c0_i32_0 : i32
    scf.if %2 {
      %cst_34 = arith.constant 0.000000e+00 : f32
      %102 = vector.broadcast %cst_34 : f32 to vector<8x128xf32>
      %c0_35 = arith.constant 0 : index
      %c0_36 = arith.constant 0 : index
      %103 = vector.load %arg6[%c0_35, %c0_36] : memref<8x128xf32, #tpu.memory_space<vmem>>, vector<8x128xf32>
      tpu.vector_store %arg6[%c0_35, %c0_36], %102 {strides = array<i32>} : memref<8x128xf32, #tpu.memory_space<vmem>>, vector<8x128xf32>,
      %cst_37 = arith.constant 0.000000e+00 : f32
      %104 = vector.broadcast %cst_37 : f32 to vector<8x128xf32>
      %c0_38 = arith.constant 0 : index
      %c0_39 = arith.constant 0 : index
      %105 = vector.load %arg7[%c0_38, %c0_39] : memref<8x128xf32, #tpu.memory_space<vmem>>, vector<8x128xf32>
      tpu.vector_store %arg7[%c0_38, %c0_39], %104 {strides = array<i32>} : memref<8x128xf32, #tpu.memory_space<vmem>>, vector<8x128xf32>,
    } else {
    }
    %c0 = arith.constant 0 : index
    %c0_1 = arith.constant 0 : index
    %3 = vector.load %arg6[%c0, %c0_1] : memref<8x128xf32, #tpu.memory_space<vmem>>, vector<8x128xf32>
    %c0_2 = arith.constant 0 : index
    %c0_3 = arith.constant 0 : index
    %4 = vector.load %arg7[%c0_2, %c0_3] : memref<8x128xf32, #tpu.memory_space<vmem>>, vector<8x128xf32>
    %c0_i32_4 = arith.constant 0 : i32
    %5 = arith.index_cast %c0_i32_4 : i32 to index
    %c0_5 = arith.constant 0 : index
    %c0_6 = arith.constant 0 : index
    %6 = vector.load %arg1[%5, %c0_5, %c0_6] : memref<4x8x512xf32, #tpu.memory_space<vmem>>, vector<1x8x512xf32>
    %7 = vector.shape_cast %6 : vector<1x8x512xf32> to vector<8x512xf32>
    %8 = arith.truncf %3 : vector<8x128xf32> to vector<8x128xbf16>
    %c0_7 = arith.constant 0 : index
    %c0_8 = arith.constant 0 : index
    %9 = vector.load %arg2[%c0_7, %c0_8] : memref<128x512xbf16, #tpu.memory_space<vmem>>, vector<128x512xbf16>
    %cst = arith.constant dense<0.000000e+00> : vector<8x512xf32>
    %10 = tpu.matmul %8, %9, %cst {dimension_numbers = #tpu.dot_dimension_numbers<[1], [0], [0], [1], [0, 0, 1, 1], [], []>} : vector<8x128xbf16>, vector<128x512xbf16>, vector<8x512xf32> -> vector<8x512xf32>
    %11 = arith.addf %7, %10 : vector<8x512xf32>
    %12 = vector.extract_strided_slice %11 {offsets = [0, 0], sizes = [8, 384], strides = [1, 1]} : vector<8x512xf32> to vector<8x384xf32>
    %13 = arith.negf %12 : vector<8x384xf32>
    %14 = math.exp %13 : vector<8x384xf32>
    %cst_9 = arith.constant 1.000000e+00 : f32
    %15 = vector.broadcast %cst_9 : f32 to vector<8x384xf32>
    %16 = arith.addf %15, %14 : vector<8x384xf32>
    %17 = arith.divf %15, %16 : vector<8x384xf32>
    %18 = vector.extract_strided_slice %17 {offsets = [0, 0], sizes = [8, 128], strides = [1, 1]} : vector<8x384xf32> to vector<8x128xf32>
    %19 = vector.extract_strided_slice %17 {offsets = [0, 128], sizes = [8, 128], strides = [1, 1]} : vector<8x384xf32> to vector<8x128xf32>
    %20 = vector.extract_strided_slice %17 {offsets = [0, 256], sizes = [8, 128], strides = [1, 1]} : vector<8x384xf32> to vector<8x128xf32>
    %21 = vector.extract_strided_slice %11 {offsets = [0, 384], sizes = [8, 128], strides = [1, 1]} : vector<8x512xf32> to vector<8x128xf32>
    %22 = math.tanh %21 : vector<8x128xf32>
    %23 = arith.mulf %19, %4 : vector<8x128xf32>
    %24 = arith.mulf %18, %22 : vector<8x128xf32>
    %25 = arith.addf %23, %24 : vector<8x128xf32>
    %26 = math.tanh %25 : vector<8x128xf32>
    %27 = arith.mulf %20, %26 : vector<8x128xf32>
    %c1_i32 = arith.constant 1 : i32
    %28 = arith.index_cast %c1_i32 : i32 to index
    %c0_10 = arith.constant 0 : index
    %c0_11 = arith.constant 0 : index
    %29 = vector.load %arg1[%28, %c0_10, %c0_11] : memref<4x8x512xf32, #tpu.memory_space<vmem>>, vector<1x8x512xf32>
    %30 = vector.shape_cast %29 : vector<1x8x512xf32> to vector<8x512xf32>
    %31 = arith.truncf %27 : vector<8x128xf32> to vector<8x128xbf16>
    %c0_12 = arith.constant 0 : index
    %c0_13 = arith.constant 0 : index
    %32 = vector.load %arg2[%c0_12, %c0_13] : memref<128x512xbf16, #tpu.memory_space<vmem>>, vector<128x512xbf16>
    %cst_14 = arith.constant dense<0.000000e+00> : vector<8x512xf32>
    %33 = tpu.matmul %31, %32, %cst_14 {dimension_numbers = #tpu.dot_dimension_numbers<[1], [0], [0], [1], [0, 0, 1, 1], [], []>} : vector<8x128xbf16>, vector<128x512xbf16>, vector<8x512xf32> -> vector<8x512xf32>
    %34 = arith.addf %30, %33 : vector<8x512xf32>
    %35 = vector.extract_strided_slice %34 {offsets = [0, 0], sizes = [8, 384], strides = [1, 1]} : vector<8x512xf32> to vector<8x384xf32>
    %36 = arith.negf %35 : vector<8x384xf32>
    %37 = math.exp %36 : vector<8x384xf32>
    %cst_15 = arith.constant 1.000000e+00 : f32
    %38 = vector.broadcast %cst_15 : f32 to vector<8x384xf32>
    %39 = arith.addf %38, %37 : vector<8x384xf32>
    %40 = arith.divf %38, %39 : vector<8x384xf32>
    %41 = vector.extract_strided_slice %40 {offsets = [0, 0], sizes = [8, 128], strides = [1, 1]} : vector<8x384xf32> to vector<8x128xf32>
    %42 = vector.extract_strided_slice %40 {offsets = [0, 128], sizes = [8, 128], strides = [1, 1]} : vector<8x384xf32> to vector<8x128xf32>
    %43 = vector.extract_strided_slice %40 {offsets = [0, 256], sizes = [8, 128], strides = [1, 1]} : vector<8x384xf32> to vector<8x128xf32>
    %44 = vector.extract_strided_slice %34 {offsets = [0, 384], sizes = [8, 128], strides = [1, 1]} : vector<8x512xf32> to vector<8x128xf32>
    %45 = math.tanh %44 : vector<8x128xf32>
    %46 = arith.mulf %42, %25 : vector<8x128xf32>
    %47 = arith.mulf %41, %45 : vector<8x128xf32>
    %48 = arith.addf %46, %47 : vector<8x128xf32>
    %49 = math.tanh %48 : vector<8x128xf32>
    %50 = arith.mulf %43, %49 : vector<8x128xf32>
    %c2_i32 = arith.constant 2 : i32
    %51 = arith.index_cast %c2_i32 : i32 to index
    %c0_16 = arith.constant 0 : index
    %c0_17 = arith.constant 0 : index
    %52 = vector.load %arg1[%51, %c0_16, %c0_17] : memref<4x8x512xf32, #tpu.memory_space<vmem>>, vector<1x8x512xf32>
    %53 = vector.shape_cast %52 : vector<1x8x512xf32> to vector<8x512xf32>
    %54 = arith.truncf %50 : vector<8x128xf32> to vector<8x128xbf16>
    %c0_18 = arith.constant 0 : index
    %c0_19 = arith.constant 0 : index
    %55 = vector.load %arg2[%c0_18, %c0_19] : memref<128x512xbf16, #tpu.memory_space<vmem>>, vector<128x512xbf16>
    %cst_20 = arith.constant dense<0.000000e+00> : vector<8x512xf32>
    %56 = tpu.matmul %54, %55, %cst_20 {dimension_numbers = #tpu.dot_dimension_numbers<[1], [0], [0], [1], [0, 0, 1, 1], [], []>} : vector<8x128xbf16>, vector<128x512xbf16>, vector<8x512xf32> -> vector<8x512xf32>
    %57 = arith.addf %53, %56 : vector<8x512xf32>
    %58 = vector.extract_strided_slice %57 {offsets = [0, 0], sizes = [8, 384], strides = [1, 1]} : vector<8x512xf32> to vector<8x384xf32>
    %59 = arith.negf %58 : vector<8x384xf32>
    %60 = math.exp %59 : vector<8x384xf32>
    %cst_21 = arith.constant 1.000000e+00 : f32
    %61 = vector.broadcast %cst_21 : f32 to vector<8x384xf32>
    %62 = arith.addf %61, %60 : vector<8x384xf32>
    %63 = arith.divf %61, %62 : vector<8x384xf32>
    %64 = vector.extract_strided_slice %63 {offsets = [0, 0], sizes = [8, 128], strides = [1, 1]} : vector<8x384xf32> to vector<8x128xf32>
    %65 = vector.extract_strided_slice %63 {offsets = [0, 128], sizes = [8, 128], strides = [1, 1]} : vector<8x384xf32> to vector<8x128xf32>
    %66 = vector.extract_strided_slice %63 {offsets = [0, 256], sizes = [8, 128], strides = [1, 1]} : vector<8x384xf32> to vector<8x128xf32>
    %67 = vector.extract_strided_slice %57 {offsets = [0, 384], sizes = [8, 128], strides = [1, 1]} : vector<8x512xf32> to vector<8x128xf32>
    %68 = math.tanh %67 : vector<8x128xf32>
    %69 = arith.mulf %65, %48 : vector<8x128xf32>
    %70 = arith.mulf %64, %68 : vector<8x128xf32>
    %71 = arith.addf %69, %70 : vector<8x128xf32>
    %72 = math.tanh %71 : vector<8x128xf32>
    %73 = arith.mulf %66, %72 : vector<8x128xf32>
    %c3_i32 = arith.constant 3 : i32
    %74 = arith.index_cast %c3_i32 : i32 to index
    %c0_22 = arith.constant 0 : index
    %c0_23 = arith.constant 0 : index
    %75 = vector.load %arg1[%74, %c0_22, %c0_23] : memref<4x8x512xf32, #tpu.memory_space<vmem>>, vector<1x8x512xf32>
    %76 = vector.shape_cast %75 : vector<1x8x512xf32> to vector<8x512xf32>
    %77 = arith.truncf %73 : vector<8x128xf32> to vector<8x128xbf16>
    %c0_24 = arith.constant 0 : index
    %c0_25 = arith.constant 0 : index
    %78 = vector.load %arg2[%c0_24, %c0_25] : memref<128x512xbf16, #tpu.memory_space<vmem>>, vector<128x512xbf16>
    %cst_26 = arith.constant dense<0.000000e+00> : vector<8x512xf32>
    %79 = tpu.matmul %77, %78, %cst_26 {dimension_numbers = #tpu.dot_dimension_numbers<[1], [0], [0], [1], [0, 0, 1, 1], [], []>} : vector<8x128xbf16>, vector<128x512xbf16>, vector<8x512xf32> -> vector<8x512xf32>
    %80 = arith.addf %76, %79 : vector<8x512xf32>
    %81 = vector.extract_strided_slice %80 {offsets = [0, 0], sizes = [8, 384], strides = [1, 1]} : vector<8x512xf32> to vector<8x384xf32>
    %82 = arith.negf %81 : vector<8x384xf32>
    %83 = math.exp %82 : vector<8x384xf32>
    %cst_27 = arith.constant 1.000000e+00 : f32
    %84 = vector.broadcast %cst_27 : f32 to vector<8x384xf32>
    %85 = arith.addf %84, %83 : vector<8x384xf32>
    %86 = arith.divf %84, %85 : vector<8x384xf32>
    %87 = vector.extract_strided_slice %86 {offsets = [0, 0], sizes = [8, 128], strides = [1, 1]} : vector<8x384xf32> to vector<8x128xf32>
    %88 = vector.extract_strided_slice %86 {offsets = [0, 128], sizes = [8, 128], strides = [1, 1]} : vector<8x384xf32> to vector<8x128xf32>
    %89 = vector.extract_strided_slice %86 {offsets = [0, 256], sizes = [8, 128], strides = [1, 1]} : vector<8x384xf32> to vector<8x128xf32>
    %90 = vector.extract_strided_slice %80 {offsets = [0, 384], sizes = [8, 128], strides = [1, 1]} : vector<8x512xf32> to vector<8x128xf32>
    %91 = math.tanh %90 : vector<8x128xf32>
    %92 = arith.mulf %88, %71 : vector<8x128xf32>
    %93 = arith.mulf %87, %91 : vector<8x128xf32>
    %94 = arith.addf %92, %93 : vector<8x128xf32>
    %95 = math.tanh %94 : vector<8x128xf32>
    %96 = arith.mulf %89, %95 : vector<8x128xf32>
    %c4_i32 = arith.constant 4 : i32
    %c0_28 = arith.constant 0 : index
    %c0_29 = arith.constant 0 : index
    %97 = vector.load %arg6[%c0_28, %c0_29] : memref<8x128xf32, #tpu.memory_space<vmem>>, vector<8x128xf32>
    tpu.vector_store %arg6[%c0_28, %c0_29], %96 {strides = array<i32>} : memref<8x128xf32, #tpu.memory_space<vmem>>, vector<8x128xf32>,
    %c0_30 = arith.constant 0 : index
    %c0_31 = arith.constant 0 : index
    %98 = vector.load %arg7[%c0_30, %c0_31] : memref<8x128xf32, #tpu.memory_space<vmem>>, vector<8x128xf32>
    tpu.vector_store %arg7[%c0_30, %c0_31], %94 {strides = array<i32>} : memref<8x128xf32, #tpu.memory_space<vmem>>, vector<8x128xf32>,
    %c1_i32_32 = arith.constant 1 : i32
    %99 = arith.cmpi eq, %arg0, %c1_i32_32 : i32
    %100 = arith.extui %99 : i1 to i32
    %c0_i32_33 = arith.constant 0 : i32
    %101 = arith.cmpi ne, %100, %c0_i32_33 : i32
    scf.if %101 {
      %102 = arith.truncf %96 : vector<8x128xf32> to vector<8x128xbf16>
      %c0_34 = arith.constant 0 : index
      %c0_35 = arith.constant 0 : index
      %103 = vector.load %arg3[%c0_34, %c0_35] : memref<128x128xbf16, #tpu.memory_space<vmem>>, vector<128x128xbf16>
      %cst_36 = arith.constant dense<0.000000e+00> : vector<8x128xf32>
      %104 = tpu.matmul %102, %103, %cst_36 {dimension_numbers = #tpu.dot_dimension_numbers<[1], [0], [0], [1], [0, 0, 1, 1], [], []>} : vector<8x128xbf16>, vector<128x128xbf16>, vector<8x128xf32> -> vector<8x128xf32>
      %c0_37 = arith.constant 0 : index
      %c0_38 = arith.constant 0 : index
      %105 = vector.load %arg4[%c0_37, %c0_38] : memref<1x128xf32, #tpu.memory_space<vmem>>, vector<1x128xf32>
      %106 = vector.broadcast %105 : vector<1x128xf32> to vector<8x128xf32>
      %107 = arith.addf %104, %106 : vector<8x128xf32>
      %c0_39 = arith.constant 0 : index
      %c0_40 = arith.constant 0 : index
      %108 = vector.load %arg5[%c0_39, %c0_40] : memref<8x128xf32, #tpu.memory_space<vmem>>, vector<8x128xf32>
      tpu.vector_store %arg5[%c0_39, %c0_40], %107 {strides = array<i32>} : memref<8x128xf32, #tpu.memory_space<vmem>>, vector<8x128xf32>,
    } else {
    }
    return
  }
  func.func @transform_0(%arg0: i32) -> (i32, i32, i32) {
    %c0_i32 = arith.constant 0 : i32
    %c0_i32_0 = arith.constant 0 : i32
    %c0_i32_1 = arith.constant 0 : i32
    return %arg0, %c0_i32, %c0_i32_0 : i32, i32, i32
  }
  func.func @transform_1(%arg0: i32) -> (i32, i32) {
    %c0_i32 = arith.constant 0 : i32
    %c0_i32_0 = arith.constant 0 : i32
    %c0_i32_1 = arith.constant 0 : i32
    return %c0_i32, %c0_i32_0 : i32, i32
  }
  func.func @transform_2(%arg0: i32) -> (i32, i32) {
    %c0_i32 = arith.constant 0 : i32
    %c0_i32_0 = arith.constant 0 : i32
    %c0_i32_1 = arith.constant 0 : i32
    return %c0_i32, %c0_i32_0 : i32, i32
  }
  func.func @transform_3(%arg0: i32) -> (i32, i32) {
    %c0_i32 = arith.constant 0 : i32
    %c0_i32_0 = arith.constant 0 : i32
    %c0_i32_1 = arith.constant 0 : i32
    return %c0_i32, %c0_i32_0 : i32, i32
  }
  func.func @transform_4(%arg0: i32) -> (i32, i32) {
    %c0_i32 = arith.constant 0 : i32
    %c0_i32_0 = arith.constant 0 : i32
    %c0_i32_1 = arith.constant 0 : i32
    return %c0_i32, %c0_i32_0 : i32, i32
  }
}

</mosaic_0001>

<bundles_post_ra>
// kernel: _lambda_.2
= control target key start
LH: loop header
LB: loop body
LE: loop exit
PB: predicated region body
PF: predicated region fallthrough
CT: control target
= control target key end

     0   :  { %v311_v1 = vmov 0   ;;  %vm89_vm0 = vcmask 130048   ;;  %v29_v9 = vlaneseq  ;;  %s503_s1 = inlined_call_operand.vmem [shape: bf16[16,512], index: 1, kind: input, shape index: {}]   ;;  %s504_s0 = inlined_call_operand.vmem [shape: bf16[64,16], index: 0, kind: input, shape index: {}]   ;;  %s505_s2 = inlined_call_operand.vmem [shape: f32[1,512], index: 2, kind: input, shape index: {}]   ;;  %s506_s3 = inlined_call_operand.vmem [shape: f32[64,512], index: 3, kind: output, shape index: {}]  }
   0x1   :  { %v301_v0 = vld [vmem:[%s503_s1 + $0x4] ss:$16 sps:$4 sm:$0xff]   ;;  %134 = vmatprep.mubr.bf16.mxu0 %v311_v1  ;;  %207 = vmatprep.mubr.bf16.mxu1 %v311_v1  ;;  %v303_v2 = vld [vmem:[%s503_s1 + $0xc] ss:$16 sps:$4 sm:$0xff]   ;;  %v305_v3 = vld [vmem:[%s503_s1] ss:$16 sps:$4 sm:$0xff]  }
   0x2   :  { %102 = vmatprep.subr.bf16.mxu0 %v301_v0  ;;  %v306_v4 = vld [vmem:[%s503_s1 + $0x8] ss:$16 sps:$4 sm:$0xff]   ;;  %175 = vmatprep.subr.bf16.mxu1 %v303_v2  ;;  %v307_v5 = vld [vmem:[%s504_s0] sm:$0xff]   ;;  %v309_v7 = vld [vmem:[%s504_s0 + $0x10] sm:$0xff]   ;;  %v30_v10 = vshrl.u32 %v29_v9, 7 }
   0x3   :  { %103 = vmatpush1.bf16.msra.mxu0 %v305_v3  ;;  %176 = vmatpush1.bf16.msra.mxu1 %v306_v4  ;;  %v308_v6 = vld [vmem:[%s504_s0 + $0x8] sm:$0xff]   ;;  %v310_v8 = vld [vmem:[%s504_s0 + $0x18] sm:$0xff]   ;;  %v27_v13 = vld [vmem:[%s505_s2] sm:$0xf] }
   0x4   :  { %v31_v11 = vsub.s32 0, %v30_v10  ;;  %v39_v12 = vsub.s32 2, %v30_v10  ;;  %v35_v14 = vsub.s32 1, %v30_v10  ;;  %v43_v15 = vsub.s32 3, %v30_v10 }
   0x6   :  { %292 = vmatmul.mubr.msk.bf16.vlgmr.msra.gmra.mrb[0].mxu0 %vm89_vm0, %v307_v5  ;;  %296 = vmatmul.mubr.msk.bf16.vlgmr.msra.gmra.mrb[0].mxu1 %vm89_vm0, %v307_v5  ;;  %v367_v16 = vrot.slane %v27_v13, %v31_v11  ;;  %v369_v17 = vrot.slane %v27_v13, %v39_v12  ;;  %v371_v18 = vrot.slane %v27_v13, %v35_v14 }
   0x7   :  { %144 = vmatprep.mubr.bf16.mxu0 %v311_v1  ;;  %217 = vmatprep.mubr.bf16.mxu1 %v311_v1  ;;  %v373_v19 = vrot.slane %v27_v13, %v43_v15 }
   0xe   :  { %293 = vmatmul.mubr.msk.bf16.gmra.mrb[4].mxu0 %vm89_vm0, %v308_v6  ;;  %297 = vmatmul.mubr.msk.bf16.gmra.mrb[4].mxu1 %vm89_vm0, %v308_v6 }
   0xf   :  { %154 = vmatprep.mubr.bf16.mxu0 %v311_v1  ;;  %227 = vmatprep.mubr.bf16.mxu1 %v311_v1 }
  0x16   :  { %294 = vmatmul.mubr.msk.bf16.gmra.mrb[8].mxu0 %vm89_vm0, %v309_v7  ;;  %298 = vmatmul.mubr.msk.bf16.gmra.mrb[8].mxu1 %vm89_vm0, %v309_v7 }
  0x17   :  { %164 = vmatprep.mubr.bf16.mxu0 %v311_v1  ;;  %237 = vmatprep.mubr.bf16.mxu1 %v311_v1 }
  0x1e   :  { %295 = vmatmul.mubr.msk.bf16.gmra.mrb[12].mxu0 %vm89_vm0, %v310_v8  ;;  %299 = vmatmul.mubr.msk.bf16.gmra.mrb[12].mxu1 %vm89_vm0, %v310_v8 }
  0xd9   :  { %v136_v20 = vpop.f32.mrb[0].mxu0  ;;  %v209_v21 = vpop.f32.mrb[0].mxu1 }
  0xda   :  { %v137_v22 = vadd.f32 %v136_v20, %v367_v16  ;;  %v210_v23 = vadd.f32 %v209_v21, %v369_v17  ;;  %v138_v24 = vpop.f32.mrb[1].mxu0  ;;  %v211_v25 = vpop.f32.mrb[1].mxu1 }
  0xdb   :  { %v139_v26 = vadd.f32 %v138_v24, %v371_v18  ;;  %v212_v27 = vadd.f32 %v211_v25, %v373_v19  ;;  %v140_v28 = vpop.f32.mrb[2].mxu0  ;;  %v213_v29 = vpop.f32.mrb[2].mxu1 }
  0xdc   :  { %248 = vst [vmem:[%s506_s3] sm:$0xff] %v137_v22  ;;  %250 = vst [vmem:[%s506_s3 + $0x10] sm:$0xff] %v210_v23  ;;  %v141_v30 = vadd.f32 %v140_v28, %v367_v16  ;;  %v214_v31 = vadd.f32 %v213_v29, %v369_v17  ;;  %v142_v32 = vpop.f32.mrb[3].mxu0  ;;  %v215_v33 = vpop.f32.mrb[3].mxu1 }
  0xdd   :  { %249 = vst [vmem:[%s506_s3 + $0x8] sm:$0xff] %v139_v26  ;;  %251 = vst [vmem:[%s506_s3 + $0x18] sm:$0xff] %v212_v27  ;;  %v143_v34 = vadd.f32 %v142_v32, %v371_v18  ;;  %v216_v35 = vadd.f32 %v215_v33, %v373_v19 }
  0xde   :  { %252 = vst [vmem:[%s506_s3 + $0x20] sm:$0xff] %v141_v30  ;;  %254 = vst [vmem:[%s506_s3 + $0x30] sm:$0xff] %v214_v31 }
  0xdf   :  { %253 = vst [vmem:[%s506_s3 + $0x28] sm:$0xff] %v143_v34  ;;  %255 = vst [vmem:[%s506_s3 + $0x38] sm:$0xff] %v216_v35 }
  0xe1   :  { %v146_v36 = vpop.f32.mrb[4].mxu0  ;;  %v219_v37 = vpop.f32.mrb[4].mxu1 }
  0xe2   :  { %v147_v38 = vadd.f32 %v146_v36, %v367_v16  ;;  %v220_v39 = vadd.f32 %v219_v37, %v369_v17  ;;  %v148_v40 = vpop.f32.mrb[5].mxu0  ;;  %v221_v41 = vpop.f32.mrb[5].mxu1 }
  0xe3   :  { %v149_v42 = vadd.f32 %v148_v40, %v371_v18  ;;  %v222_v43 = vadd.f32 %v221_v41, %v373_v19  ;;  %v150_v44 = vpop.f32.mrb[6].mxu0  ;;  %v223_v45 = vpop.f32.mrb[6].mxu1 }
  0xe4   :  { %256 = vst [vmem:[%s506_s3 + $0x40] sm:$0xff] %v147_v38  ;;  %258 = vst [vmem:[%s506_s3 + $0x50] sm:$0xff] %v220_v39  ;;  %v151_v46 = vadd.f32 %v150_v44, %v367_v16  ;;  %v224_v47 = vadd.f32 %v223_v45, %v369_v17  ;;  %v152_v48 = vpop.f32.mrb[7].mxu0  ;;  %v225_v49 = vpop.f32.mrb[7].mxu1 }
  0xe5   :  { %257 = vst [vmem:[%s506_s3 + $0x48] sm:$0xff] %v149_v42  ;;  %259 = vst [vmem:[%s506_s3 + $0x58] sm:$0xff] %v222_v43  ;;  %v153_v50 = vadd.f32 %v152_v48, %v371_v18  ;;  %v226_v51 = vadd.f32 %v225_v49, %v373_v19 }
  0xe6   :  { %260 = vst [vmem:[%s506_s3 + $0x60] sm:$0xff] %v151_v46  ;;  %262 = vst [vmem:[%s506_s3 + $0x70] sm:$0xff] %v224_v47 }
  0xe7   :  { %261 = vst [vmem:[%s506_s3 + $0x68] sm:$0xff] %v153_v50  ;;  %263 = vst [vmem:[%s506_s3 + $0x78] sm:$0xff] %v226_v51 }
  0xe9   :  { %v156_v52 = vpop.f32.mrb[8].mxu0  ;;  %v229_v53 = vpop.f32.mrb[8].mxu1 }
  0xea   :  { %v157_v54 = vadd.f32 %v156_v52, %v367_v16  ;;  %v230_v55 = vadd.f32 %v229_v53, %v369_v17  ;;  %v158_v56 = vpop.f32.mrb[9].mxu0  ;;  %v231_v57 = vpop.f32.mrb[9].mxu1 }
  0xeb   :  { %v159_v58 = vadd.f32 %v158_v56, %v371_v18  ;;  %v232_v59 = vadd.f32 %v231_v57, %v373_v19  ;;  %v160_v60 = vpop.f32.mrb[10].mxu0  ;;  %v233_v61 = vpop.f32.mrb[10].mxu1 }
  0xec   :  { %264 = vst [vmem:[%s506_s3 + $0x80] sm:$0xff] %v157_v54  ;;  %266 = vst [vmem:[%s506_s3 + $0x90] sm:$0xff] %v230_v55  ;;  %v161_v62 = vadd.f32 %v160_v60, %v367_v16  ;;  %v234_v63 = vadd.f32 %v233_v61, %v369_v17  ;;  %v162_v0 = vpop.f32.mrb[11].mxu0  ;;  %v235_v1 = vpop.f32.mrb[11].mxu1 }
  0xed   :  { %265 = vst [vmem:[%s506_s3 + $0x88] sm:$0xff] %v159_v58  ;;  %267 = vst [vmem:[%s506_s3 + $0x98] sm:$0xff] %v232_v59  ;;  %v163_v2 = vadd.f32 %v162_v0, %v371_v18  ;;  %v236_v3 = vadd.f32 %v235_v1, %v373_v19 }
  0xee   :  { %268 = vst [vmem:[%s506_s3 + $0xa0] sm:$0xff] %v161_v62  ;;  %270 = vst [vmem:[%s506_s3 + $0xb0] sm:$0xff] %v234_v63 }
  0xef   :  { %269 = vst [vmem:[%s506_s3 + $0xa8] sm:$0xff] %v163_v2  ;;  %271 = vst [vmem:[%s506_s3 + $0xb8] sm:$0xff] %v236_v3 }
  0xf1   :  { %v166_v4 = vpop.f32.mrb[12].mxu0  ;;  %v239_v5 = vpop.f32.mrb[12].mxu1 }
  0xf2   :  { %v167_v6 = vadd.f32 %v166_v4, %v367_v16  ;;  %v240_v7 = vadd.f32 %v239_v5, %v369_v17  ;;  %v168_v8 = vpop.f32.mrb[13].mxu0  ;;  %v241_v9 = vpop.f32.mrb[13].mxu1 }
  0xf3   :  { %v169_v10 = vadd.f32 %v168_v8, %v371_v18  ;;  %v242_v11 = vadd.f32 %v241_v9, %v373_v19  ;;  %v170_v12 = vpop.f32.mrb[14].mxu0  ;;  %v243_v13 = vpop.f32.mrb[14].mxu1 }
  0xf4   :  { %272 = vst [vmem:[%s506_s3 + $0xc0] sm:$0xff] %v167_v6  ;;  %274 = vst [vmem:[%s506_s3 + $0xd0] sm:$0xff] %v240_v7  ;;  %v171_v14 = vadd.f32 %v170_v12, %v367_v16  ;;  %v244_v15 = vadd.f32 %v243_v13, %v369_v17  ;;  %v172_v20 = vpop.f32.mrb[15].mxu0  ;;  %v245_v21 = vpop.f32.mrb[15].mxu1 }
  0xf5   :  { %273 = vst [vmem:[%s506_s3 + $0xc8] sm:$0xff] %v169_v10  ;;  %275 = vst [vmem:[%s506_s3 + $0xd8] sm:$0xff] %v242_v11  ;;  %v173_v22 = vadd.f32 %v172_v20, %v371_v18  ;;  %v246_v23 = vadd.f32 %v245_v21, %v373_v19 }
  0xf6   :  { %276 = vst [vmem:[%s506_s3 + $0xe0] sm:$0xff] %v171_v14  ;;  %278 = vst [vmem:[%s506_s3 + $0xf0] sm:$0xff] %v244_v15 }
  0xf7   :  { %277 = vst [vmem:[%s506_s3 + $0xe8] sm:$0xff] %v173_v22  ;;  %279 = vst [vmem:[%s506_s3 + $0xf8] sm:$0xff] %v246_v23 }

// kernel: _lambda_.3
= control target key start
LH: loop header
LB: loop body
LE: loop exit
PB: predicated region body
PF: predicated region fallthrough
CT: control target
= control target key end

     0   :  { %9 = vsyncpa [#allocation5], 0  ;;  %s1333_s15 = smov 0   ;;  %s1724_s0 = inlined_call_operand.vmem [shape: f32[8,8,512], index: 0, kind: input, shape index: {}]   ;;  %s1725_s1 = inlined_call_operand.vmem [shape: bf16[128,512], index: 1, kind: input, shape index: {}]   ;;  %s1726_s2 = inlined_call_operand.vmem [shape: bf16[128,128], index: 2, kind: input, shape index: {}]   ;;  %s1727_s3 = inlined_call_operand.vmem [shape: f32[1,128], index: 3, kind: input, shape index: {}]   ;;  %s1728_s4 = inlined_call_operand.hbm [shape: f32[8,128], index: 4, kind: output, shape index: {}]  }
   0x1 LB: > { %s1339_s16 = sadd.s32 4294967295, %s1301_s15   ;;  %p1021_p0 = scmp.ge.s32.totalorder %s1301_s15, 1  ;;  %s1301_s15 = sphi %s1333_s15, %s15_s15  }
   0x2   : > { %p160_p1 = scmp.lt.s32.totalorder %s1301_s15, 3 }
   0x4   : > { %p161_p2 = pnand %p1021_p0, %p160_p1 }
   0x5   : > { %s1022_s17 = sshll.u32 (!%p161_p2), %s1339_s16, 2  ;;  %p1025_p4 = scmp.ne.s32.totalorder (!%p161_p2), %s1339_s16, 0 }
   0x6   : > { %164 = sbr.rel (%p161_p2) target bundleno = 1334 (0x536), region = 36  ;;  %p183_p3 = scmp.lt.s32.totalorder (!%p161_p2), %s1022_s17, 7 }
   0xd   : > { %s1730_s17 = smov (!%p183_p3, %s1022_s17), 7  ;;  %193 = sbr.rel (%p1025_p4) target bundleno = 20 (0x14), region = 40 }
   0xe   : > { %s1096_s18 = sshll.u32 %s1730_s17, 5  ;;  %v1303_v0 = vmov (!%p1025_p4), 0.0  }
   0xf   : > { %s1347_s21 = scalar_lea.vmem %s1724_s0, %s1096_s18  ;;  %194 = vst [vmem:[#allocation2] sm:$0xff] (!%p1025_p4), %v1303_v0  ;;  %195 = vst [vmem:[#allocation3] sm:$0xff] (!%p1025_p4), %v1303_v0 }
  0x14 PF: > { %v1353_v1 = vld [vmem:[%s1725_s1 + $0x4] ss:$16 sps:$4 sm:$0xff]   ;;  %v1358_v2 = vld [vmem:[%s1725_s1] ss:$16 sps:$4 sm:$0xff]   ;;  %v1304_v3 = vmov 0   ;;  %v199_v37 = vld [vmem:[%s1347_s21 + $0x8] sm:$0xff] }
  0x15   : > { %427 = vmatprep.mubr.bf16.mxu0 %v1304_v3  ;;  %468 = vmatprep.mubr.bf16.mxu1 %v1304_v3  ;;  %v1366_v4 = vld [vmem:[%s1725_s1 + $0x24] ss:$16 sps:$4 sm:$0xff]   ;;  %v1372_v5 = vld [vmem:[%s1725_s1 + $0x20] ss:$16 sps:$4 sm:$0xff]   ;;  %v1383_v7 = vld [vmem:[%s1725_s1 + $0xc] ss:$16 sps:$4 sm:$0xff]  }
  0x16   : > { %395 = vmatprep.subr.bf16.mxu0 %v1353_v1  ;;  %v1378_v6 = vld [vmem:[%s1725_s1 + $0x44] ss:$16 sps:$4 sm:$0xff]   ;;  %v1388_v8 = vld [vmem:[%s1725_s1 + $0x8] ss:$16 sps:$4 sm:$0xff]   ;;  %v1394_v9 = vld [vmem:[%s1725_s1 + $0x40] ss:$16 sps:$4 sm:$0xff]   ;;  %436 = vmatprep.subr.bf16.mxu1 %v1383_v7 }
  0x17   : > { %396 = vmatpush1.bf16.msra.mxu0 %v1358_v2  ;;  %v1401_v10 = vld [vmem:[%s1725_s1 + $0x64] ss:$16 sps:$4 sm:$0xff]   ;;  %437 = vmatpush1.bf16.msra.mxu1 %v1388_v8  ;;  %v1407_v11 = vld [vmem:[%s1725_s1 + $0x2c] ss:$16 sps:$4 sm:$0xff]   ;;  %v1412_v12 = vld [vmem:[%s1725_s1 + $0x28] ss:$16 sps:$4 sm:$0xff]  }
  0x18   : > { %397 = vmatprep.subr.bf16.mxu0 %v1366_v4  ;;  %438 = vmatprep.subr.bf16.mxu1 %v1407_v11  ;;  %v1419_v13 = vld [vmem:[%s1725_s1 + $0x60] ss:$16 sps:$4 sm:$0xff]   ;;  %v1424_v14 = vld [vmem:[%s1725_s1 + $0x84] ss:$16 sps:$4 sm:$0xff]   ;;  %v1429_v15 = vld [vmem:[%s1725_s1 + $0x4c] ss:$16 sps:$4 sm:$0xff]  }
  0x19   : > { %v1436_v16 = vld [vmem:[%s1725_s1 + $0x48] ss:$16 sps:$4 sm:$0xff]   ;;  %v1442_v17 = vld [vmem:[%s1725_s1 + $0x6c] ss:$16 sps:$4 sm:$0xff]   ;;  %v1448_v18 = vld [vmem:[%s1725_s1 + $0x80] ss:$16 sps:$4 sm:$0xff]  }
  0x1a   : > { %v1454_v19 = vld [vmem:[%s1725_s1 + $0xa4] ss:$16 sps:$4 sm:$0xff]   ;;  %v1460_v20 = vld [vmem:[%s1725_s1 + $0x68] ss:$16 sps:$4 sm:$0xff]   ;;  %v1466_v21 = vld [vmem:[%s1725_s1 + $0x8c] ss:$16 sps:$4 sm:$0xff]  }
  0x1b   : > { %398 = vmatpush1.bf16.msra.mxu0 %v1372_v5  ;;  %439 = vmatpush1.bf16.msra.mxu1 %v1412_v12  ;;  %v1471_v22 = vld [vmem:[%s1725_s1 + $0xa0] ss:$16 sps:$4 sm:$0xff]   ;;  %v1477_v23 = vld [vmem:[%s1725_s1 + $0xc4] ss:$16 sps:$4 sm:$0xff]   ;;  %v1484_v24 = vld [vmem:[%s1725_s1 + $0x88] ss:$16 sps:$4 sm:$0xff]  }
  0x1c   : > { %399 = vmatprep.subr.bf16.mxu0 %v1378_v6  ;;  %440 = vmatprep.subr.bf16.mxu1 %v1429_v15  ;;  %v1490_v25 = vld [vmem:[%s1725_s1 + $0xac] ss:$16 sps:$4 sm:$0xff]   ;;  %v1496_v26 = vld [vmem:[%s1725_s1 + $0xc0] ss:$16 sps:$4 sm:$0xff]   ;;  %v1502_v27 = vld [vmem:[%s1725_s1 + $0xe4] ss:$16 sps:$4 sm:$0xff]  }
  0x1d   : > { %v1508_v28 = vld [vmem:[%s1725_s1 + $0xa8] ss:$16 sps:$4 sm:$0xff]   ;;  %v1514_v29 = vld [vmem:[%s1725_s1 + $0xcc] ss:$16 sps:$4 sm:$0xff]   ;;  %v1520_v30 = vld [vmem:[%s1725_s1 + $0xe0] ss:$16 sps:$4 sm:$0xff]  }
  0x1e   : > { %v196_v31 = vld [vmem:[#allocation2] sm:$0xff]  ;;  %v1527_v32 = vld [vmem:[%s1725_s1 + $0xc8] ss:$16 sps:$4 sm:$0xff]   ;;  %v1533_v33 = vld [vmem:[%s1725_s1 + $0xec] ss:$16 sps:$4 sm:$0xff]   ;;  %p1082_p5 = scmp.ne.s32.totalorder %s1339_s16, 1 }
  0x1f   : > { %400 = vmatpush1.bf16.msra.mxu0 %v1394_v9  ;;  %441 = vmatpush1.bf16.msra.mxu1 %v1436_v16  ;;  %v202_v34 = vpack.c.bf16 %v196_v31, %v196_v31  ;;  %v1540_v35 = vld [vmem:[%s1725_s1 + $0xe8] ss:$16 sps:$4 sm:$0xff]   ;;  %v198_v36 = vld [vmem:[%s1347_s21] sm:$0xff]  ;;  %v200_v46 = vld [vmem:[%s1347_s21 + $0x10] sm:$0xff]  ;;  %vm1306_vm0 = vmmov (!%p1082_p5), 0  }
  0x20   : > { %401 = vmatprep.subr.bf16.mxu0 %v1401_v10  ;;  %442 = vmatprep.subr.bf16.mxu1 %v1442_v17  ;;  %v201_v52 = vld [vmem:[%s1347_s21 + $0x18] sm:$0xff]  ;;  %v197_v61 = vld [vmem:[#allocation3] sm:$0xff] }
  0x23   : > { %402 = vmatpush1.bf16.msra.mxu0 %v1419_v13  ;;  %443 = vmatpush1.bf16.msra.mxu1 %v1460_v20 }
  0x24   : > { %403 = vmatprep.subr.bf16.mxu0 %v1424_v14  ;;  %444 = vmatprep.subr.bf16.mxu1 %v1466_v21 }
  0x27   : > { %404 = vmatpush1.bf16.msra.mxu0 %v1448_v18  ;;  %445 = vmatpush1.bf16.msra.mxu1 %v1484_v24 }
  0x28   : > { %405 = vmatprep.subr.bf16.mxu0 %v1454_v19  ;;  %446 = vmatprep.subr.bf16.mxu1 %v1490_v25 }
  0x2b   : > { %406 = vmatpush1.bf16.msra.mxu0 %v1471_v22  ;;  %447 = vmatpush1.bf16.msra.mxu1 %v1508_v28 }
  0x2c   : > { %407 = vmatprep.subr.bf16.mxu0 %v1477_v23  ;;  %448 = vmatprep.subr.bf16.mxu1 %v1514_v29 }
  0x2f   : > { %408 = vmatpush1.bf16.msra.mxu0 %v1496_v26  ;;  %449 = vmatpush1.bf16.msra.mxu1 %v1527_v32 }
  0x30   : > { %409 = vmatprep.subr.bf16.mxu0 %v1502_v27  ;;  %450 = vmatprep.subr.bf16.mxu1 %v1533_v33 }
  0x33   : > { %410 = vmatpush1.bf16.msra.mxu0 %v1520_v30  ;;  %451 = vmatpush1.bf16.msra.mxu1 %v1540_v35 }
  0x34   : > { %511 = vmatprep.subr.bf16.mxu0 %v1353_v1  ;;  %552 = vmatprep.subr.bf16.mxu1 %v1383_v7 }
  0x36   : > { %428 = vmatmul.mubr.bf16.vlgmr.msra.gmra.mrb[0].mxu0 %v202_v34  ;;  %469 = vmatmul.mubr.bf16.vlgmr.msra.gmra.mrb[0].mxu1 %v202_v34 }
  0x37   : > { %512 = vmatpush1.bf16.msra.mxu0 %v1358_v2  ;;  %543 = vmatprep.mubr.bf16.mxu0 %v1304_v3 }
  0x38   : > { %513 = vmatprep.subr.bf16.mxu0 %v1366_v4  ;;  %553 = vmatpush1.bf16.msra.mxu1 %v1388_v8 }
  0x39   : > { %554 = vmatprep.subr.bf16.mxu1 %v1407_v11  ;;  %584 = vmatprep.mubr.bf16.mxu1 %v1304_v3 }
  0x3b   : > { %514 = vmatpush1.bf16.msra.mxu0 %v1372_v5 }
  0x3c   : > { %515 = vmatprep.subr.bf16.mxu0 %v1378_v6  ;;  %555 = vmatpush1.bf16.msra.mxu1 %v1412_v12 }
  0x3d   : > { %556 = vmatprep.subr.bf16.mxu1 %v1429_v15 }
  0x3f   : > { %516 = vmatpush1.bf16.msra.mxu0 %v1394_v9 }
  0x40   : > { %517 = vmatprep.subr.bf16.mxu0 %v1401_v10  ;;  %557 = vmatpush1.bf16.msra.mxu1 %v1436_v16 }
  0x41   : > { %558 = vmatprep.subr.bf16.mxu1 %v1442_v17 }
  0x43   : > { %518 = vmatpush1.bf16.msra.mxu0 %v1419_v13 }
  0x44   : > { %519 = vmatprep.subr.bf16.mxu0 %v1424_v14  ;;  %559 = vmatpush1.bf16.msra.mxu1 %v1460_v20 }
  0x45   : > { %560 = vmatprep.subr.bf16.mxu1 %v1466_v21 }
  0x47   : > { %520 = vmatpush1.bf16.msra.mxu0 %v1448_v18 }
  0x48   : > { %521 = vmatprep.subr.bf16.mxu0 %v1454_v19  ;;  %561 = vmatpush1.bf16.msra.mxu1 %v1484_v24 }
  0x49   : > { %562 = vmatprep.subr.bf16.mxu1 %v1490_v25 }
  0x4b   : > { %522 = vmatpush1.bf16.msra.mxu0 %v1471_v22 }
  0x4c   : > { %523 = vmatprep.subr.bf16.mxu0 %v1477_v23  ;;  %563 = vmatpush1.bf16.msra.mxu1 %v1508_v28 }
  0x4d   : > { %564 = vmatprep.subr.bf16.mxu1 %v1514_v29 }
  0x4f   : > { %524 = vmatpush1.bf16.msra.mxu0 %v1496_v26 }
  0x50   : > { %525 = vmatprep.subr.bf16.mxu0 %v1502_v27  ;;  %565 = vmatpush1.bf16.msra.mxu1 %v1527_v32 }
  0x51   : > { %566 = vmatprep.subr.bf16.mxu1 %v1533_v33 }
  0x53   : > { %526 = vmatpush1.bf16.msra.mxu0 %v1520_v30 }
  0x54   : > { %627 = vmatprep.subr.bf16.mxu0 %v1353_v1  ;;  %567 = vmatpush1.bf16.msra.mxu1 %v1540_v35 }
  0x55   : > { %668 = vmatprep.subr.bf16.mxu1 %v1383_v7 }
 0x109   : > { %v429_v38 = vpop.f32.mrb[0].mxu0  ;;  %v470_v47 = vpop.f32.mrb[0].mxu1 }
 0x10a   : > { %v477_v39 = vadd.f32 %v429_v38, %v198_v36  ;;  %v431_v40 = vpop.f32.mrb[1].mxu0  ;;  %v472_v48 = vpop.f32.mrb[1].mxu1  ;;  %v479_v49 = vadd.f32 %v470_v47, %v200_v46 }
 0x10b   : > { %v478_v41 = vadd.f32 %v431_v40, %v199_v37  ;;  %v433_v42 = vpop.f32.mrb[2].mxu0  ;;  %v474_v50 = vpop.f32.mrb[2].mxu1  ;;  %v480_v54 = vadd.f32 %v472_v48, %v201_v52 }
 0x10c   : > { %v1058_v43 = vmul.f32 -1.442695, %v477_v39  ;;  %v434_v44 = vpop.f32.mrb[3].mxu0  ;;  %v475_v51 = vpop.f32.mrb[3].mxu1  ;;  %v1060_v53 = vmul.f32 -1.442695, %v479_v49 }
 0x10d   : > { %v1059_v45 = vmul.f32 -1.442695, %v478_v41  ;;  %v1061_v41 = vld [vmem:[%s1347_s21 + $0x20] sm:$0xff]  ;;  %v1062_v42 = vld [vmem:[%s1347_s21 + $0x28] sm:$0xff] }
 0x10e   : > { %1193 = vpow2.f32 %v1058_v43 }
 0x10f   : > { %1195 = vpow2.f32 %v1059_v45 }
 0x110   : > { %1197 = vpow2.f32 %v1060_v53 }
 0x111   : > { %1199 = vtanh.f32 %v480_v54 }
 0x118   : > { %v1194_v55 = vpop.eup %1193 }
 0x119   : > { %v1196_v56 = vpop.eup %1195  ;;  %v490_v57 = vadd.f32 1.0, %v1194_v55  ;;  %v1064_v55 = vld [vmem:[%s1347_s21 + $0x38] sm:$0xff] }
 0x11a   : > { %v491_v58 = vadd.f32 1.0, %v1196_v56  ;;  %v1198_v59 = vpop.eup %1197 }
 0x11b   : > { %1201 = vrcp.f32 %v490_v57  ;;  %v1200_v60 = vpop.eup %1199  ;;  %v492_v63 = vadd.f32 1.0, %v1198_v59 }
 0x11c   : > { %1203 = vrcp.f32 %v491_v58 }
 0x11d   : > { %1205 = vrcp.f32 %v492_v63 }
 0x125   : > { %v1202_v62 = vpop.eup %1201 }
 0x126   : > { %v1204_v0 = vpop.eup %1203  ;;  %v501_v31 = vmul.f32 %v1202_v62, %v1200_v60 }
 0x127   : > { %v500_v34 = vmul.f32 %v1204_v0, %v197_v61  ;;  %v1206_v37 = vpop.eup %1205 }
 0x129   : > { %v1584_v36 = vadd.f32 %v501_v31, %v500_v34 }
 0x12b   : > { %1207 = vtanh.f32 %v1584_v36 }
 0x135   : > { %v1208_v38 = vpop.eup %1207 }
 0x136   : > { %v504_v39 = vmul.f32 %v1208_v38, %v1206_v37 }
 0x138   : > { %v510_v40 = vpack.c.bf16 %v504_v39, %v504_v39 }
 0x13a   : > { %544 = vmatmul.mubr.bf16.vlgmr.msra.gmra.mrb[4].mxu0 %v510_v40  ;;  %585 = vmatmul.mubr.bf16.vlgmr.msra.gmra.mrb[4].mxu1 %v510_v40 }
 0x13b   : > { %628 = vmatpush1.bf16.msra.mxu0 %v1358_v2  ;;  %669 = vmatpush1.bf16.msra.mxu1 %v1388_v8 }
 0x13c   : > { %629 = vmatprep.subr.bf16.mxu0 %v1366_v4  ;;  %670 = vmatprep.subr.bf16.mxu1 %v1407_v11 }
 0x13d   : > { %659 = vmatprep.mubr.bf16.mxu0 %v1304_v3  ;;  %700 = vmatprep.mubr.bf16.mxu1 %v1304_v3 }
 0x13f   : > { %630 = vmatpush1.bf16.msra.mxu0 %v1372_v5  ;;  %671 = vmatpush1.bf16.msra.mxu1 %v1412_v12 }
 0x140   : > { %631 = vmatprep.subr.bf16.mxu0 %v1378_v6  ;;  %672 = vmatprep.subr.bf16.mxu1 %v1429_v15 }
 0x143   : > { %632 = vmatpush1.bf16.msra.mxu0 %v1394_v9  ;;  %673 = vmatpush1.bf16.msra.mxu1 %v1436_v16 }
 0x144   : > { %633 = vmatprep.subr.bf16.mxu0 %v1401_v10  ;;  %674 = vmatprep.subr.bf16.mxu1 %v1442_v17 }
 0x147   : > { %634 = vmatpush1.bf16.msra.mxu0 %v1419_v13  ;;  %675 = vmatpush1.bf16.msra.mxu1 %v1460_v20 }
 0x148   : > { %635 = vmatprep.subr.bf16.mxu0 %v1424_v14  ;;  %676 = vmatprep.subr.bf16.mxu1 %v1466_v21 }
 0x14b   : > { %636 = vmatpush1.bf16.msra.mxu0 %v1448_v18  ;;  %677 = vmatpush1.bf16.msra.mxu1 %v1484_v24 }
 0x14c   : > { %637 = vmatprep.subr.bf16.mxu0 %v1454_v19  ;;  %678 = vmatprep.subr.bf16.mxu1 %v1490_v25 }
 0x14f   : > { %638 = vmatpush1.bf16.msra.mxu0 %v1471_v22  ;;  %679 = vmatpush1.bf16.msra.mxu1 %v1508_v28 }
 0x150   : > { %639 = vmatprep.subr.bf16.mxu0 %v1477_v23  ;;  %680 = vmatprep.subr.bf16.mxu1 %v1514_v29 }
 0x153   : > { %640 = vmatpush1.bf16.msra.mxu0 %v1496_v26  ;;  %681 = vmatpush1.bf16.msra.mxu1 %v1527_v32 }
 0x154   : > { %641 = vmatprep.subr.bf16.mxu0 %v1502_v27  ;;  %682 = vmatprep.subr.bf16.mxu1 %v1533_v33 }
 0x157   : > { %642 = vmatpush1.bf16.msra.mxu0 %v1520_v30  ;;  %683 = vmatpush1.bf16.msra.mxu1 %v1540_v35 }
 0x158   : > { %743 = vmatprep.subr.bf16.mxu0 %v1353_v1  ;;  %784 = vmatprep.subr.bf16.mxu1 %v1383_v7  ;;  %v1063_v1 = vld [vmem:[%s1347_s21 + $0x30] sm:$0xff] }
 0x20d   : > { %v545_v43 = vpop.f32.mrb[4].mxu0  ;;  %v586_v44 = vpop.f32.mrb[4].mxu1 }
 0x20e   : > { %v593_v45 = vadd.f32 %v1061_v41, %v545_v43  ;;  %v547_v46 = vpop.f32.mrb[5].mxu0  ;;  %v588_v47 = vpop.f32.mrb[5].mxu1  ;;  %v595_v7 = vadd.f32 %v1063_v1, %v586_v44 }
 0x20f   : > { %v594_v48 = vadd.f32 %v1062_v42, %v547_v46  ;;  %v549_v49 = vpop.f32.mrb[6].mxu0  ;;  %v590_v50 = vpop.f32.mrb[6].mxu1  ;;  %v596_v56 = vadd.f32 %v1064_v55, %v588_v47  ;;  %v1075_v47 = vld [vmem:[%s1347_s21 + $0x60] sm:$0xff] }
 0x210   : > { %v1065_v51 = vmul.f32 -1.442695, %v593_v45  ;;  %v550_v52 = vpop.f32.mrb[7].mxu0  ;;  %v591_v53 = vpop.f32.mrb[7].mxu1  ;;  %v1067_v57 = vmul.f32 -1.442695, %v595_v7 }
 0x211   : > { %v1066_v54 = vmul.f32 -1.442695, %v594_v48  ;;  %v1076_v48 = vld [vmem:[%s1347_s21 + $0x68] sm:$0xff] }
 0x212   : > { %1209 = vpow2.f32 %v1065_v51 }
 0x213   : > { %1211 = vpow2.f32 %v1066_v54 }
 0x214   : > { %1213 = vtanh.f32 %v596_v56 }
 0x215   : > { %1215 = vpow2.f32 %v1067_v57 }
 0x21c   : > { %v1210_v58 = vpop.eup %1209 }
 0x21d   : > { %v606_v59 = vadd.f32 1.0, %v1210_v58  ;;  %v1212_v60 = vpop.eup %1211 }
 0x21e   : > { %v607_v61 = vadd.f32 1.0, %v1212_v60  ;;  %v1214_v62 = vpop.eup %1213 }
 0x21f   : > { %1217 = vrcp.f32 %v606_v59  ;;  %v1216_v63 = vpop.eup %1215  ;;  %v1077_v59 = vld [vmem:[%s1347_s21 + $0x70] sm:$0xff] }
 0x220   : > { %1219 = vrcp.f32 %v607_v61  ;;  %v608_v37 = vadd.f32 1.0, %v1216_v63  ;;  %v1078_v61 = vld [vmem:[%s1347_s21 + $0x78] sm:$0xff] }
 0x222   : > { %1221 = vrcp.f32 %v608_v37 }
 0x229   : > { %v1218_v0 = vpop.eup %1217 }
 0x22a   : > { %v617_v31 = vmul.f32 %v1218_v0, %v1214_v62  ;;  %v1220_v34 = vpop.eup %1219 }
 0x22b   : > { %v616_v38 = vmul.f32 %v1220_v34, %v1584_v36 }
 0x22c   : > { %v1222_v40 = vpop.eup %1221 }
 0x22d   : > { %v1626_v39 = vadd.f32 %v617_v31, %v616_v38 }
 0x22f   : > { %1223 = vtanh.f32 %v1626_v39 }
 0x239   : > { %v1224_v41 = vpop.eup %1223 }
 0x23a   : > { %v620_v42 = vmul.f32 %v1224_v41, %v1222_v40 }
 0x23c   : > { %v626_v43 = vpack.c.bf16 %v620_v42, %v620_v42 }
 0x23e   : > { %660 = vmatmul.mubr.bf16.vlgmr.msra.gmra.mrb[8].mxu0 %v626_v43  ;;  %701 = vmatmul.mubr.bf16.vlgmr.msra.gmra.mrb[8].mxu1 %v626_v43 }
 0x23f   : > { %744 = vmatpush1.bf16.msra.mxu0 %v1358_v2  ;;  %785 = vmatpush1.bf16.msra.mxu1 %v1388_v8  ;;  %v1068_v2 = vld [vmem:[%s1347_s21 + $0x40] sm:$0xff] }
 0x240   : > { %745 = vmatprep.subr.bf16.mxu0 %v1366_v4  ;;  %786 = vmatprep.subr.bf16.mxu1 %v1407_v11 }
 0x241   : > { %775 = vmatprep.mubr.bf16.mxu0 %v1304_v3  ;;  %816 = vmatprep.mubr.bf16.mxu1 %v1304_v3  ;;  %v1069_v3 = vld [vmem:[%s1347_s21 + $0x48] sm:$0xff] }
 0x243   : > { %746 = vmatpush1.bf16.msra.mxu0 %v1372_v5  ;;  %787 = vmatpush1.bf16.msra.mxu1 %v1412_v12 }
 0x244   : > { %747 = vmatprep.subr.bf16.mxu0 %v1378_v6  ;;  %788 = vmatprep.subr.bf16.mxu1 %v1429_v15 }
 0x247   : > { %748 = vmatpush1.bf16.msra.mxu0 %v1394_v9  ;;  %789 = vmatpush1.bf16.msra.mxu1 %v1436_v16 }
 0x248   : > { %749 = vmatprep.subr.bf16.mxu0 %v1401_v10  ;;  %790 = vmatprep.subr.bf16.mxu1 %v1442_v17  ;;  %v1070_v17 = vld [vmem:[%s1347_s21 + $0x50] sm:$0xff] }
 0x24b   : > { %750 = vmatpush1.bf16.msra.mxu0 %v1419_v13  ;;  %791 = vmatpush1.bf16.msra.mxu1 %v1460_v20 }
 0x24c   : > { %751 = vmatprep.subr.bf16.mxu0 %v1424_v14  ;;  %792 = vmatprep.subr.bf16.mxu1 %v1466_v21 }
 0x24f   : > { %752 = vmatpush1.bf16.msra.mxu0 %v1448_v18  ;;  %793 = vmatpush1.bf16.msra.mxu1 %v1484_v24 }
 0x250   : > { %753 = vmatprep.subr.bf16.mxu0 %v1454_v19  ;;  %794 = vmatprep.subr.bf16.mxu1 %v1490_v25  ;;  %v1071_v19 = vld [vmem:[%s1347_s21 + $0x58] sm:$0xff] }
 0x253   : > { %754 = vmatpush1.bf16.msra.mxu0 %v1471_v22  ;;  %795 = vmatpush1.bf16.msra.mxu1 %v1508_v28 }
 0x254   : > { %755 = vmatprep.subr.bf16.mxu0 %v1477_v23  ;;  %796 = vmatprep.subr.bf16.mxu1 %v1514_v29 }
 0x257   : > { %756 = vmatpush1.bf16.msra.mxu0 %v1496_v26  ;;  %797 = vmatpush1.bf16.msra.mxu1 %v1527_v32 }
 0x258   : > { %757 = vmatprep.subr.bf16.mxu0 %v1502_v27  ;;  %798 = vmatprep.subr.bf16.mxu1 %v1533_v33 }
 0x25b   : > { %758 = vmatpush1.bf16.msra.mxu0 %v1520_v30  ;;  %799 = vmatpush1.bf16.msra.mxu1 %v1540_v35 }
 0x311   : > { %v661_v4 = vpop.f32.mrb[8].mxu0  ;;  %v702_v5 = vpop.f32.mrb[8].mxu1 }
 0x312   : > { %v709_v6 = vadd.f32 %v1068_v2, %v661_v4  ;;  %v663_v8 = vpop.f32.mrb[9].mxu0  ;;  %v704_v9 = vpop.f32.mrb[9].mxu1  ;;  %v711_v18 = vadd.f32 %v1070_v17, %v702_v5 }
 0x313   : > { %v710_v10 = vadd.f32 %v1069_v3, %v663_v8  ;;  %v665_v11 = vpop.f32.mrb[10].mxu0  ;;  %v706_v12 = vpop.f32.mrb[10].mxu1  ;;  %v712_v20 = vadd.f32 %v1071_v19, %v704_v9  ;;  %v1257_v8 = vld [vmem:[%s1726_s2] sm:$0xff] (!%p1082_p5)   ;;  %v1305_v9 = vmov (!%p1082_p5), 0.0  }
 0x314   : > { %v1072_v13 = vmul.f32 -1.442695, %v709_v6  ;;  %v666_v14 = vpop.f32.mrb[11].mxu0  ;;  %v707_v15 = vpop.f32.mrb[11].mxu1  ;;  %v1074_v21 = vmul.f32 -1.442695, %v711_v18  ;;  %1106 = vmatprep.subr.bf16.mxu0 (!%p1082_p5), %v1305_v9 }
 0x315   : > { %v1073_v16 = vmul.f32 -1.442695, %v710_v10  ;;  %v1258_v10 = vld [vmem:[%s1726_s2 + $0x8] sm:$0xff] (!%p1082_p5)   ;;  %v1259_v11 = vld [vmem:[%s1726_s2 + $0x10] sm:$0xff] (!%p1082_p5)   ;;  %v1260_v12 = vld [vmem:[%s1726_s2 + $0x18] sm:$0xff] (!%p1082_p5)  }
 0x316   : > { %1225 = vpow2.f32 %v1072_v13  ;;  %v1261_v13 = vld [vmem:[%s1726_s2 + $0x20] sm:$0xff] (!%p1082_p5)   ;;  %v1262_v14 = vld [vmem:[%s1726_s2 + $0x28] sm:$0xff] (!%p1082_p5)   ;;  %v1263_v15 = vld [vmem:[%s1726_s2 + $0x30] sm:$0xff] (!%p1082_p5)  }
 0x317   : > { %1227 = vpow2.f32 %v1073_v16  ;;  %v1264_v16 = vld [vmem:[%s1726_s2 + $0x38] sm:$0xff] (!%p1082_p5)   ;;  %v1083_v18 = vld [vmem:[%s1727_s3] ss:$0 sm:$0xff] (!%p1082_p5) }
 0x318   : > { %1229 = vtanh.f32 %v712_v20 }
 0x319   : > { %1231 = vpow2.f32 %v1074_v21 }
 0x320   : > { %v1226_v22 = vpop.eup %1225 }
 0x321   : > { %v722_v23 = vadd.f32 1.0, %v1226_v22  ;;  %v1228_v24 = vpop.eup %1227 }
 0x322   : > { %v723_v25 = vadd.f32 1.0, %v1228_v24  ;;  %v1230_v26 = vpop.eup %1229 }
 0x323   : > { %1233 = vrcp.f32 %v722_v23  ;;  %v1232_v27 = vpop.eup %1231 }
 0x324   : > { %1235 = vrcp.f32 %v723_v25  ;;  %v724_v32 = vadd.f32 1.0, %v1232_v27 }
 0x326   : > { %1237 = vrcp.f32 %v724_v32 }
 0x32d   : > { %v1234_v28 = vpop.eup %1233 }
 0x32e   : > { %v733_v29 = vmul.f32 %v1234_v28, %v1230_v26  ;;  %v1236_v30 = vpop.eup %1235 }
 0x32f   : > { %v732_v33 = vmul.f32 %v1236_v30, %v1626_v39 }
 0x330   : > { %v1238_v36 = vpop.eup %1237 }
 0x331   : > { %v734_v35 = vadd.f32 %v733_v29, %v732_v33 }
 0x333   : > { %1239 = vtanh.f32 %v734_v35 }
 0x33d   : > { %v1240_v44 = vpop.eup %1239 }
 0x33e   : > { %v736_v45 = vmul.f32 %v1240_v44, %v1238_v36 }
 0x340   : > { %v742_v46 = vpack.c.bf16 %v736_v45, %v736_v45 }
 0x342   : > { %776 = vmatmul.mubr.bf16.vlgmr.msra.gmra.mrb[12].mxu0 %v742_v46  ;;  %817 = vmatmul.mubr.bf16.vlgmr.msra.gmra.mrb[12].mxu1 %v742_v46 }
 0x343   : > { %1107 = vmatpush3.bf16.msra.mxu0 (!%p1082_p5), %v1257_v8  ;;  %1122 = vmatprep.mubr.msk.bf16.mxu0 (!%p1082_p5), %vm1306_vm0, %v1305_v9 }
 0x344   : > { %1108 = vmatprep.subr.bf16.mxu0 (!%p1082_p5), %v1305_v9 }
 0x347   : > { %1109 = vmatpush3.bf16.msra.mxu0 (!%p1082_p5), %v1258_v10 }
 0x348   : > { %1110 = vmatprep.subr.bf16.mxu0 (!%p1082_p5), %v1305_v9 }
 0x34b   : > { %1111 = vmatpush3.bf16.msra.mxu0 (!%p1082_p5), %v1259_v11 }
 0x34c   : > { %1112 = vmatprep.subr.bf16.mxu0 (!%p1082_p5), %v1305_v9 }
 0x34f   : > { %1113 = vmatpush3.bf16.msra.mxu0 (!%p1082_p5), %v1260_v12 }
 0x350   : > { %1114 = vmatprep.subr.bf16.mxu0 (!%p1082_p5), %v1305_v9 }
 0x353   : > { %1115 = vmatpush3.bf16.msra.mxu0 (!%p1082_p5), %v1261_v13 }
 0x354   : > { %1116 = vmatprep.subr.bf16.mxu0 (!%p1082_p5), %v1305_v9 }
 0x357   : > { %1117 = vmatpush3.bf16.msra.mxu0 (!%p1082_p5), %v1262_v14 }
 0x358   : > { %1118 = vmatprep.subr.bf16.mxu0 (!%p1082_p5), %v1305_v9 }
 0x35b   : > { %1119 = vmatpush3.bf16.msra.mxu0 (!%p1082_p5), %v1263_v15 }
 0x35c   : > { %1120 = vmatprep.subr.bf16.mxu0 (!%p1082_p5), %v1305_v9 }
 0x35f   : > { %1121 = vmatpush3.bf16.msra.mxu0 (!%p1082_p5), %v1264_v16 }
 0x415   : > { %v777_v49 = vpop.f32.mrb[12].mxu0  ;;  %v818_v50 = vpop.f32.mrb[12].mxu1 }
 0x416   : > { %v825_v51 = vadd.f32 %v1075_v47, %v777_v49  ;;  %v779_v52 = vpop.f32.mrb[13].mxu0  ;;  %v820_v53 = vpop.f32.mrb[13].mxu1  ;;  %v827_v60 = vadd.f32 %v1077_v59, %v818_v50 }
 0x417   : > { %v826_v54 = vadd.f32 %v1076_v48, %v779_v52  ;;  %v781_v1 = vpop.f32.mrb[14].mxu0  ;;  %v822_v7 = vpop.f32.mrb[14].mxu1  ;;  %v828_v62 = vadd.f32 %v1078_v61, %v820_v53 }
 0x418   : > { %v1079_v55 = vmul.f32 -1.442695, %v825_v51  ;;  %v782_v56 = vpop.f32.mrb[15].mxu0  ;;  %v823_v57 = vpop.f32.mrb[15].mxu1  ;;  %v1081_v63 = vmul.f32 -1.442695, %v827_v60 }
 0x419   : > { %v1080_v58 = vmul.f32 -1.442695, %v826_v54 }
 0x41a   : > { %1241 = vpow2.f32 %v1079_v55 }
 0x41b   : > { %1243 = vpow2.f32 %v1080_v58 }
 0x41c   : > { %1245 = vtanh.f32 %v828_v62 }
 0x41d   : > { %1247 = vpow2.f32 %v1081_v63 }
 0x424   : > { %v1242_v0 = vpop.eup %1241 }
 0x425   : > { %v838_v31 = vadd.f32 1.0, %v1242_v0  ;;  %v1244_v34 = vpop.eup %1243 }
 0x426   : > { %v839_v37 = vadd.f32 1.0, %v1244_v34  ;;  %v1246_v38 = vpop.eup %1245 }
 0x427   : > { %1249 = vrcp.f32 %v838_v31  ;;  %v1248_v39 = vpop.eup %1247 }
 0x428   : > { %1251 = vrcp.f32 %v839_v37  ;;  %v840_v43 = vadd.f32 1.0, %v1248_v39 }
 0x42a   : > { %1253 = vrcp.f32 %v840_v43 }
 0x431   : > { %v1250_v40 = vpop.eup %1249 }
 0x432   : > { %v849_v41 = vmul.f32 %v1250_v40, %v1246_v38  ;;  %v1252_v42 = vpop.eup %1251 }
 0x433   : > { %v848_v2 = vmul.f32 %v1252_v42, %v734_v35 }
 0x434   : > { %v1254_v4 = vpop.eup %1253 }
 0x435   : > { %v850_v3 = vadd.f32 %v849_v41, %v848_v2 }
 0x437   : > { %1255 = vtanh.f32 %v850_v3  ;;  %854 = vst [vmem:[#allocation3] sm:$0xff] %v850_v3 }
 0x43e   : > { %858 = sbr.rel (%p1082_p5) target bundleno = 1309 (0x51d), region = 44 }
 0x441   : > { %v1256_v5 = vpop.eup %1255 }
 0x442   : > { %v852_v6 = vmul.f32 %v1256_v5, %v1254_v4 }
 0x444   : > { %853 = vst [vmem:[#allocation2] sm:$0xff] %v852_v6  ;;  %v859_v17 = vpack.c.bf16 (!%p1082_p5), %v852_v6, %v852_v6 }
 0x446   : > { %1123 = vmatmul.mubr.bf16.vlgmr.msra.gmra.mrb[0].mxu0 %v859_v17 }
 0x519   : > { %v965_v19 = vpop.f32.mrb[0].mxu0 }
 0x51a   : > { %v966_v20 = vadd.f32 %v1083_v18, %v965_v19  ;;  %v1124_v21 = vpop.f32.mrb[1].mxu0 }
 0x51b   : > { %v968_v22 = vpop.f32.mrb[2].mxu0 }
 0x51c   : > { %971 = vst [vmem:[#allocation4] sm:$0xff] %v966_v20  ;;  %v1125_v23 = vpop.f32.mrb[3].mxu0 }
 0x51d PF: > { %p1130_p6 = scmp.eq.s32.totalorder %s1339_s16, 1  ;;  %s1307_s8 = smov [#allocation4]  }
 0x51e   : > { %s979_s9 = sshll.u32 %s1307_s8, 4  ;;  %s980_s9 = int_to_ptr.vmem [resolvable:$true] %s979_s9 }
 0x51f   : > { %s1265_s10 = scalar_lea.vmem %s980_s9, 128  ;;  %p1272_p10 = scmp.lt.s32.totalorder %s980_s9, %s980_s9 }
 0x520   : > { %p1266_p7 = scmp.ne.s32.totalorder %s980_s9, %s1265_s10  ;;  %p1273_p11 = scmp.lt.s32.totalorder %s1265_s10, %s1265_s10 }
 0x522   : > { %p1267_p8 = pnand %p1266_p7, %p1130_p6  ;;  %p1274_p12 = por %p1273_p11, %p1272_p10 }
 0x524   : > { %p1268_p9 = pneg %p1267_p8 }
 0x526   : > { %p1275_p13 = pnand %p1274_p12, %p1268_p9 }
 0x528   : > { %1278 = shalt.err (!%p1275_p13)
}
 0x529   : > { %s1279_s13 = scalar_lea.hbm %s1728_s4, 128 }
 0x52a   : > { %p1280_p0 = scmp.ne.s32.totalorder %s1728_s4, %s1279_s13  ;;  %p1285_p3 = scmp.lt.u32.totalorder %s1279_s13, %s1728_s4 }
 0x52c   : > { %p1281_p1 = pnand %p1280_p0, %p1130_p6 }
 0x52e   : > { %p1282_p2 = pneg %p1281_p1 }
 0x530   : > { %p1287_p4 = pnand %p1285_p3, %p1282_p2 }
 0x532   : > { %1290 = shalt.err (!%p1287_p4)
}
 0x533   : > { %1127 = dma.vmem_to_hbm [thread:$0]  (%p1130_p6), %s980_s9, 128, %s1728_s4, [#allocation5]  }
 0x534   : > { %1296 = dma.done.wait (%p1130_p6), [#allocation5], 128  }
 0x535   : > { %1298 = vsyncadd (%p1130_p6), [#allocation5], 4294967168 }
 0x536 PF: > { %s15_s15 = sadd.s32 1, %s1301_s15  }
 0x537   : > { %p12_p5 = scmp.ge.s32.totalorder %s15_s15, 4  }
 0x539   :  { %14 = sbr.rel (!%p12_p5) target bundleno = 1 (0x1), region = 74 }
 0x540   :  { %992 = vsyncpa [#allocation5], 1 }
 0x541   :  { %994 = vsyncpa [#allocation5 + $0x1], 1 }

</bundles_post_ra>
